<compile_context>
chip_gen: v5e
topology: v5e:2x2
jax: 0.10.0
libtpu: 0.0.40
codegen_flags: <defaults>
</compile_context>

<pallas_src>
import jax
import jax.numpy as jnp
from jax.experimental import pallas as pl
from jax.experimental.pallas import tpu as pltpu

_LANES = 1024                          # lane-dense last dim: 8 sublanes * 128 lanes
_TARGET_BLOCK_BYTES = 2 * 1024 * 1024  # ~2 MiB per array per block (dtype-agnostic)
_TINY_BYTES = 64 * 1024                # single-block fast-path threshold


def _add_kernel(x_ref, y_ref, o_ref):
    # Elementwise add on the current tile.
    o_ref[...] = x_ref[...] + y_ref[...]


def _round_up(n: int, m: int) -> int:
    return ((n + m - 1) // m) * m


def _grid_add_2d(x2d: jax.Array, y2d: jax.Array) -> jax.Array:
    """Tiled elementwise add over a lane-dense (rows, 1024) layout."""
    rows, _ = x2d.shape
    itemsize = x2d.dtype.itemsize
    block_rows = max(8, _TARGET_BLOCK_BYTES // (_LANES * itemsize))
    block_rows = min(block_rows, rows)  # rows < block_rows -> full-dim block (always legal)
    spec = pl.BlockSpec((block_rows, _LANES), lambda i: (i, 0))
    n_elems = rows * _LANES
    return pl.pallas_call(
        _add_kernel,
        out_shape=jax.ShapeDtypeStruct((rows, _LANES), x2d.dtype),
        grid=(pl.cdiv(rows, block_rows),),  # ragged last block is safe for elementwise add
        in_specs=[spec, spec],
        out_specs=spec,
        compiler_params=pltpu.CompilerParams(
            dimension_semantics=("parallel",),
            vmem_limit_bytes=48 * 1024 * 1024,
        ),
        cost_estimate=pl.CostEstimate(
            flops=n_elems,
            transcendentals=0,
            bytes_accessed=3 * n_elems * itemsize,
        ),
    )(x2d, y2d)


def basic_module_forward(x: jax.Array, y: jax.Array) -> jax.Array:
    """Equivalent of BasicModule.forward: returns x + y (same shape/dtype)."""
    assert x.shape == y.shape and x.dtype == y.dtype
    orig_shape = x.shape
    n = x.size
    itemsize = x.dtype.itemsize

    if n == 0:  # degenerate empty input — nothing to compute
        return x + y

    # Tiny-input fast path: one full-array block, no grid, no pad/slice ops.
    if n * itemsize <= _TINY_BYTES:
        xs = x.reshape(1, n) if x.ndim < 2 else x
        ys = y.reshape(1, n) if y.ndim < 2 else y
        out = pl.pallas_call(
            _add_kernel,
            out_shape=jax.ShapeDtypeStruct(xs.shape, xs.dtype),
        )(xs, ys)
        return out.reshape(orig_shape)

    # Aligned fast path: free reshape to lane-dense layout, no padding at all.
    if n % _LANES == 0:
        rows = n // _LANES
        out2d = _grid_add_2d(x.reshape(rows, _LANES), y.reshape(rows, _LANES))
        return out2d.reshape(orig_shape)

    # Fallback: pad flat only up to the next 1024-lane multiple (no row padding).
    padded_n = _round_up(n, _LANES)
    rows = padded_n // _LANES
    pad = padded_n - n

    def _to2d(a: jax.Array) -> jax.Array:
        return jnp.pad(a.reshape(-1), (0, pad)).reshape(rows, _LANES)

    out2d = _grid_add_2d(_to2d(x), _to2d(y))
    return out2d.reshape(-1)[:n].reshape(orig_shape)


if __name__ == "__main__":
    key = jax.random.PRNGKey(0)
    kx, ky, k2, k3 = jax.random.split(key, 4)

    # Matches BasicModule.get_random_inputs(): two length-10 float vectors.
    x = jax.random.normal(kx, (10,), dtype=jnp.float32)
    y = jax.random.normal(ky, (10,), dtype=jnp.float32)
    out = basic_module_forward(x, y)
    jax.block_until_ready(out)
    assert out.shape == x.shape and out.dtype == x.dtype
    assert jnp.allclose(out, x + y), "mismatch vs reference (N=10)"

    # Aligned grid path with a ragged final block (520 rows, 512-row blocks).
    xa = jax.random.normal(k2, (520, 1024), dtype=jnp.float32)
    ya = jax.random.normal(k2, (520, 1024), dtype=jnp.float32) * 0.5
    outa = basic_module_forward(xa, ya)
    jax.block_until_ready(outa)
    assert jnp.allclose(outa, xa + ya), "mismatch vs reference (520x1024)"

    # Unaligned fallback path (pad to 1024-lane multiple, then strip).
    xb = jax.random.normal(k3, (50, 1000), dtype=jnp.float32)
    yb = jax.random.normal(k3, (50, 1000), dtype=jnp.float32) - 1.0
    outb = basic_module_forward(xb, yb)
    jax.block_until_ready(outb)
    assert jnp.allclose(outb, xb + yb), "mismatch vs reference (50x1000)"

    print("KERNEL_OK")
</pallas_src>

<mosaic_0001>
module attributes {stable_mosaic.version = 11 : i64} {
  func.func @_add_kernel(%arg0: memref<1x10xf32, #tpu.memory_space<vmem>>, %arg1: memref<1x10xf32, #tpu.memory_space<vmem>>, %arg2: memref<1x10xf32, #tpu.memory_space<vmem>>) attributes {dimension_semantics = [], scalar_prefetch = 0 : i64, scratch_operands = 0 : i64, tpu.core_type = #tpu.core_type<tc>} {
    %c0 = arith.constant 0 : index
    %c0_0 = arith.constant 0 : index
    %0 = vector.load %arg0[%c0, %c0_0] : memref<1x10xf32, #tpu.memory_space<vmem>>, vector<1x10xf32>
    %c0_1 = arith.constant 0 : index
    %c0_2 = arith.constant 0 : index
    %1 = vector.load %arg1[%c0_1, %c0_2] : memref<1x10xf32, #tpu.memory_space<vmem>>, vector<1x10xf32>
    %2 = arith.addf %0, %1 : vector<1x10xf32>
    %c0_3 = arith.constant 0 : index
    %c0_4 = arith.constant 0 : index
    %3 = vector.load %arg2[%c0_3, %c0_4] : memref<1x10xf32, #tpu.memory_space<vmem>>, vector<1x10xf32>
    tpu.vector_store %arg2[%c0_3, %c0_4], %2 {strides = array<i32>} : memref<1x10xf32, #tpu.memory_space<vmem>>, vector<1x10xf32>,
    return
  }
}

</mosaic_0001>

<bundles_post_ra>
// kernel: tpu_custom_call.1
= control target key start
LH: loop header
LB: loop body
LE: loop exit
PB: predicated region body
PF: predicated region fallthrough
CT: control target
= control target key end

     0   :  { %7 = vsyncpa [#allocation3], 0  ;;  %s171_s0 = inlined_call_operand.hbm [shape: f32[1,10], index: 0, kind: input, shape index: {}]   ;;  %s172_s1 = inlined_call_operand.hbm [shape: f32[1,10], index: 1, kind: input, shape index: {}]   ;;  %s173_s2 = inlined_call_operand.hbm [shape: f32[1,10], index: 2, kind: output, shape index: {}]  }
   0x1   :  { %8 = vsyncpa [#allocation6], 0 }
   0x2   :  { %9 = vsyncpa [#allocation4], 0  ;;  %s15_s11 = sshll.u32 %s171_s0, 4  ;;  %s144_s12 = smov [#allocation2]   ;;  %s16_s11 = int_to_ptr.hbm [resolvable:$true] %s15_s11 }
   0x3   :  { %s17_s13 = sshll.u32 %s144_s12, 4  ;;  %s26_s16 = sshll.u32 %s172_s1, 4  ;;  %s18_s13 = int_to_ptr.vmem [resolvable:$true] %s17_s13  ;;  %s27_s16 = int_to_ptr.hbm [resolvable:$true] %s26_s16 }
   0x4   :  { %20 = dma.hbm_to_vmem [thread:$0]  %s16_s11, 16, %s18_s13, [#allocation3]  }
   0x5   :  { %s145_s17 = smov [#allocation5]  }
   0x6   :  { %s28_s18 = sshll.u32 %s145_s17, 4  ;;  %s29_s18 = int_to_ptr.vmem [resolvable:$true] %s28_s18 }
   0x7   :  { %31 = dma.hbm_to_vmem [thread:$0]  %s27_s16, 16, %s29_s18, [#allocation6]  }
   0x8   :  { %138 = dma.done.wait [#allocation3], 16  }
   0x9   :  { %139 = vsyncadd [#allocation3], 4294967280 }
   0xa   :  { %140 = dma.done.wait [#allocation6], 16  }
   0xb   :  { %141 = vsyncadd [#allocation6], 4294967280  ;;  %s146_s19 = smov [#allocation7]   ;;  %s52_s22 = sshll.u32 %s173_s2, 4  ;;  %v40_v0 = vld [vmem:[#allocation2] sm:$0x1]  ;;  %s53_s22 = int_to_ptr.hbm [resolvable:$true] %s52_s22 }
   0xc   :  { %s50_s0 = sshll.u32 %s146_s19, 4  ;;  %v41_v1 = vld [vmem:[#allocation5] sm:$0x1]  ;;  %vm43_vm0 = vcmask 73728   ;;  %s51_s0 = int_to_ptr.vmem [resolvable:$true] %s50_s0 }
   0xd   :  { %v42_v2 = vadd.f32 %v41_v1, %v40_v0 }
   0xf   :  { %44 = vst.msk [vmem:[#allocation7] sm:$0x1] %vm43_vm0, %v42_v2 }
  0x10   :  { %55 = dma.vmem_to_hbm [thread:$0]  %s51_s0, 16, %s53_s22, [#allocation4]  }
  0x11   :  { %142 = dma.done.wait [#allocation4], 16  }
  0x12   :  { %143 = vsyncadd [#allocation4], 4294967280 }
  0x13   :  { %60 = vsyncpa [#allocation3], 1 }
  0x14   :  { %61 = vsyncpa [#allocation6], 1 }
  0x15   :  { %62 = vsyncpa [#allocation4], 1 }

</bundles_post_ra>
